<compile_context>
chip_gen: v7x
topology: tpu7x:2x2x1
jax: 0.10.0
libtpu: 0.0.40
codegen_flags: <defaults>
</compile_context>

<pallas_src>
import math

import jax
import jax.numpy as jnp
from jax.experimental import pallas as pl
from jax.experimental.pallas import tpu as pltpu

_HALF_LOG_2PI = 0.5 * math.log(2.0 * math.pi)   # Python float -> jaxpr literal
_LOG_2 = math.log(2.0)


def _round_up(x, m):
    return ((x + m - 1) // m) * m


def _choose_batch_tile(b0):
    """Largest reasonable batch tile; >=2 grid steps when the batch allows (v7x megacore)."""
    if b0 <= 8:
        return _round_up(max(b0, 1), 8)
    return min(1024, _round_up((b0 + 1) // 2, 8))


def _actor_kernel(scale_ref,                       # (1,1) SMEM scalar: action_scale
                  xin_ref,                         # (BT, S+A) f32: [status | eps]
                  w0_ref, b0_ref, wh_ref, bh_ref,  # trunk weights (bf16 W, f32 b)
                  whead_ref, bhead_ref,            # fused heads (H,2A) bf16, (1,2A) f32
                  out_ref):                        # (BT, OUT_W) f32 lane-dense slab
    S = w0_ref.shape[0]
    A = whead_ref.shape[1] // 2

    xin = xin_ref[...]
    status = xin[:, :S]
    eps = xin[:, S:S + A]                          # keep f32 for the epilogue

    # ---- MLP trunk: Linear + ReLU stack (bf16 MXU operands, f32 accumulate) ---
    x = jnp.dot(status.astype(jnp.bfloat16), w0_ref[...],
                preferred_element_type=jnp.float32) + b0_ref[...]
    x = jnp.maximum(x, 0.0)
    for l in range(wh_ref.shape[0]):               # small static trunk -> unrolled
        x = jnp.dot(x.astype(jnp.bfloat16), wh_ref[l],
                    preferred_element_type=jnp.float32) + bh_ref[l]
        x = jnp.maximum(x, 0.0)

    # ---- fused heads: one matmul produces [mu | log_std] ----------------------
    heads = jnp.dot(x.astype(jnp.bfloat16), whead_ref[...],
                    preferred_element_type=jnp.float32) + bhead_ref[...]
    mu = heads[:, :A]
    log_std = heads[:, A:]
    std = jnp.exp(log_std)

    # ---- reparameterized sample (rsample) -------------------------------------
    z = mu + std * eps
    action = jnp.tanh(z) * scale_ref[0, 0]

    # ---- Normal(mu, std).log_prob(z).sum(-1) minus tanh-squash correction ------
    # exact algebra: -((z-mu)^2)/(2 std^2) == -0.5*eps^2
    t = -2.0 * z
    softplus_t = jnp.maximum(t, 0.0) + jnp.log1p(jnp.exp(-jnp.abs(t)))
    corr = 2.0 * (_LOG_2 - z - softplus_t)
    logp_elem = -0.5 * eps * eps - log_std - _HALF_LOG_2PI - corr
    logp = jnp.sum(logp_elem, axis=-1, keepdims=True)   # single XLU reduction

    # ---- single lane-dense packed store ----------------------------------------
    pad = out_ref.shape[1] - (3 * A + 1)
    zeros_pad = jnp.zeros((action.shape[0], pad), jnp.float32)
    out_ref[...] = jnp.concatenate([action, mu, log_std, logp, zeros_pad], axis=1)


def continuous_stochastic_actor_forward(status, eps, params, action_scale):
    """Returns (action, log_prob, mu, log_std) matching the PyTorch module."""
    w0, b0, wh, bh, wmu, bmu, wls, bls = params
    B0, S = status.shape
    H = w0.shape[1]
    A = wmu.shape[1]
    L = wh.shape[0]
    IN_W = S + A
    OUT_W = _round_up(3 * A + 1, 128)              # lane-dense output slab width

    # Fuse the two head projections into one (H, 2A) matmul; weights -> bf16.
    whead = jnp.concatenate([wmu, wls], axis=1).astype(jnp.bfloat16)   # (H, 2A)
    bhead = jnp.concatenate([bmu, bls], axis=1)                        # (1, 2A) f32
    w0b = w0.astype(jnp.bfloat16)
    whb = wh.astype(jnp.bfloat16)

    # Single input slab [status | eps], batch padded to a multiple of the tile.
    xin = jnp.concatenate([status, eps], axis=1)                       # (B0, S+A)
    BT = _choose_batch_tile(B0)
    B = _round_up(B0, BT)
    if B != B0:
        xin = jnp.pad(xin, ((0, B - B0), (0, 0)))
    grid = (B // BT,)

    scale = jnp.full((1, 1), action_scale, jnp.float32)

    # Explicit VMEM budget (double-buffered worst case + headroom), clamped sane.
    weight_bytes = (S * H + L * H * H + H * 2 * A) * 2                 # bf16 weights
    bias_bytes = (H + L * H + 2 * A) * 4                               # f32 biases
    io_bytes = BT * (IN_W + OUT_W) * 4
    vmem_needed = 2 * (weight_bytes + bias_bytes + io_bytes)
    vmem_limit = int(min(max(vmem_needed + (4 << 20), 32 << 20), 100 << 20))

    vmem = pltpu.MemorySpace.VMEM
    smem = pltpu.MemorySpace.SMEM
    fixed = lambda i: (0, 0)                       # whole-array block every step
    # TODO(synk): at realistic hidden sizes on v7x, single-buffer the constant weight
    # blocks (pipeline_mode=pl.Buffered(1) or a manual DMA) to halve weight VMEM.
    in_specs = [
        pl.BlockSpec((1, 1), fixed, memory_space=smem),                    # action_scale
        pl.BlockSpec((BT, IN_W), lambda i: (i, 0), memory_space=vmem),     # [status|eps]
        pl.BlockSpec((S, H), fixed, memory_space=vmem),                    # w0 (bf16)
        pl.BlockSpec((1, H), fixed, memory_space=vmem),                    # b0
        pl.BlockSpec((L, H, H), lambda i: (0, 0, 0), memory_space=vmem),   # wh (bf16)
        pl.BlockSpec((L, 1, H), lambda i: (0, 0, 0), memory_space=vmem),   # bh
        pl.BlockSpec((H, 2 * A), fixed, memory_space=vmem),                # whead (bf16)
        pl.BlockSpec((1, 2 * A), fixed, memory_space=vmem),                # bhead
    ]
    out_specs = pl.BlockSpec((BT, OUT_W), lambda i: (i, 0), memory_space=vmem)
    out_shape = jax.ShapeDtypeStruct((B, OUT_W), jnp.float32)

    slab = pl.pallas_call(
        _actor_kernel,
        out_shape=out_shape,
        grid=grid,
        in_specs=in_specs,
        out_specs=out_specs,
        compiler_params=pltpu.CompilerParams(
            dimension_semantics=("parallel",),
            vmem_limit_bytes=vmem_limit,
        ),
    )(scale, xin, w0b, b0, whb, bh, whead, bhead)

    slab = slab[:B0]
    action = slab[:, :A]
    mu = slab[:, A:2 * A]
    log_std = slab[:, 2 * A:3 * A]
    log_prob = slab[:, 3 * A]
    return action, log_prob, mu, log_std


def init_params(key, state_size, action_size, hdn_chnls, hdn_lays):
    ks = jax.random.split(key, 8)
    s = 0.1
    w0 = s * jax.random.normal(ks[0], (state_size, hdn_chnls), jnp.float32)
    b0 = s * jax.random.normal(ks[1], (1, hdn_chnls), jnp.float32)
    wh = s * jax.random.normal(ks[2], (hdn_lays, hdn_chnls, hdn_chnls), jnp.float32)
    bh = s * jax.random.normal(ks[3], (hdn_lays, 1, hdn_chnls), jnp.float32)
    wmu = s * jax.random.normal(ks[4], (hdn_chnls, action_size), jnp.float32)
    bmu = s * jax.random.normal(ks[5], (1, action_size), jnp.float32)
    wls = s * jax.random.normal(ks[6], (hdn_chnls, action_size), jnp.float32)
    bls = s * jax.random.normal(ks[7], (1, action_size), jnp.float32)
    return (w0, b0, wh, bh, wmu, bmu, wls, bls)


def reference_forward(status, eps, params, action_scale):
    """Pure-JAX f32 reference mirroring the PyTorch forward (same eps)."""
    w0, b0, wh, bh, wmu, bmu, wls, bls = params
    x = jnp.maximum(status @ w0 + b0, 0.0)
    for l in range(wh.shape[0]):
        x = jnp.maximum(x @ wh[l] + bh[l], 0.0)
    mu = x @ wmu + bmu
    log_std = x @ wls + bls
    std = jnp.exp(log_std)
    z = mu + std * eps
    action = jnp.tanh(z) * action_scale
    logp = jnp.sum(-((z - mu) ** 2) / (2.0 * std * std)
                   - log_std - 0.5 * jnp.log(2.0 * jnp.pi), axis=-1)
    logp -= jnp.sum(2.0 * (jnp.log(2.0) - z - jax.nn.softplus(-2.0 * z)), axis=-1)
    return action, logp, mu, log_std


if __name__ == "__main__":
    # Small shapes consistent with the module: status[batch, state_size]
    batch, state_size, action_size = 4, 16, 8
    hdn_chnls, hdn_lays = 32, 2
    action_scale = 2.0

    key = jax.random.PRNGKey(0)
    k_status, k_eps, k_params = jax.random.split(key, 3)

    status = jax.random.normal(k_status, (batch, state_size), jnp.float32)
    eps = jax.random.normal(k_eps, (batch, action_size), jnp.float32)  # rsample noise
    params = init_params(k_params, state_size, action_size, hdn_chnls, hdn_lays)

    outs = continuous_stochastic_actor_forward(status, eps, params, action_scale)
    outs = jax.block_until_ready(outs)
    action, log_prob, mu, log_std = outs

    # sanity check against a pure-JAX f32 reference.
    # Tolerance is loosened vs the previous f32 kernel because the matmul operands
    # are now bf16 (MXU-native on all generations); accumulate/epilogue stay f32.
    ref = reference_forward(status, eps, params, action_scale)
    for got, want in zip(outs, ref):
        assert got.shape == want.shape, (got.shape, want.shape)
        assert jnp.allclose(got, want, atol=2e-2, rtol=2e-2), (got, want)

    print("KERNEL_OK")
</pallas_src>

<mosaic_0001>
module attributes {stable_mosaic.version = 11 : i64} {
  func.func @_actor_kernel(%arg0: i32, %arg1: memref<1x1xf32, #tpu.memory_space<smem>>, %arg2: memref<8x24xf32, #tpu.memory_space<vmem>>, %arg3: memref<16x32xbf16, #tpu.memory_space<vmem>>, %arg4: memref<1x32xf32, #tpu.memory_space<vmem>>, %arg5: memref<2x32x32xbf16, #tpu.memory_space<vmem>>, %arg6: memref<2x1x32xf32, #tpu.memory_space<vmem>>, %arg7: memref<32x16xbf16, #tpu.memory_space<vmem>>, %arg8: memref<1x16xf32, #tpu.memory_space<vmem>>, %arg9: memref<8x128xf32, #tpu.memory_space<vmem>>) attributes {dimension_semantics = [#tpu.dimension_semantics<parallel>], iteration_bounds = array<i64: 1>, scalar_prefetch = 0 : i64, scratch_operands = 0 : i64, tpu.core_type = #tpu.core_type<tc>, window_params = [{transform_indices = @transform_0, window_bounds = array<i64: 1, 1>}, {transform_indices = @transform_1, window_bounds = array<i64: 8, 24>}, {pipeline_mode = #tpu.pipeline_mode<synchronous>, transform_indices = @transform_2, window_bounds = array<i64: 16, 32>}, {pipeline_mode = #tpu.pipeline_mode<synchronous>, transform_indices = @transform_3, window_bounds = array<i64: 1, 32>}, {pipeline_mode = #tpu.pipeline_mode<synchronous>, transform_indices = @transform_4, window_bounds = array<i64: 2, 32, 32>}, {pipeline_mode = #tpu.pipeline_mode<synchronous>, transform_indices = @transform_5, window_bounds = array<i64: 2, 1, 32>}, {pipeline_mode = #tpu.pipeline_mode<synchronous>, transform_indices = @transform_6, window_bounds = array<i64: 32, 16>}, {pipeline_mode = #tpu.pipeline_mode<synchronous>, transform_indices = @transform_7, window_bounds = array<i64: 1, 16>}, {transform_indices = @transform_8, window_bounds = array<i64: 8, 128>}]} {
    %c0 = arith.constant 0 : index
    %c0_0 = arith.constant 0 : index
    %0 = vector.load %arg2[%c0, %c0_0] : memref<8x24xf32, #tpu.memory_space<vmem>>, vector<8x24xf32>
    %1 = vector.extract_strided_slice %0 {offsets = [0, 0], sizes = [8, 16], strides = [1, 1]} : vector<8x24xf32> to vector<8x16xf32>
    %2 = vector.extract_strided_slice %0 {offsets = [0, 16], sizes = [8, 8], strides = [1, 1]} : vector<8x24xf32> to vector<8x8xf32>
    %3 = arith.truncf %1 : vector<8x16xf32> to vector<8x16xbf16>
    %c0_1 = arith.constant 0 : index
    %c0_2 = arith.constant 0 : index
    %4 = vector.load %arg3[%c0_1, %c0_2] : memref<16x32xbf16, #tpu.memory_space<vmem>>, vector<16x32xbf16>
    %cst = arith.constant dense<0.000000e+00> : vector<8x32xf32>
    %5 = tpu.matmul %3, %4, %cst {dimension_numbers = #tpu.dot_dimension_numbers<[1], [0], [0], [1], [0, 0, 1, 1], [], []>} : vector<8x16xbf16>, vector<16x32xbf16>, vector<8x32xf32> -> vector<8x32xf32>
    %c0_3 = arith.constant 0 : index
    %c0_4 = arith.constant 0 : index
    %6 = vector.load %arg4[%c0_3, %c0_4] : memref<1x32xf32, #tpu.memory_space<vmem>>, vector<1x32xf32>
    %7 = vector.broadcast %6 : vector<1x32xf32> to vector<8x32xf32>
    %8 = arith.addf %5, %7 : vector<8x32xf32>
    %cst_5 = arith.constant 0.000000e+00 : f32
    %9 = vector.broadcast %cst_5 : f32 to vector<8x32xf32>
    %10 = arith.maximumf %8, %9 : vector<8x32xf32>
    %11 = arith.truncf %10 : vector<8x32xf32> to vector<8x32xbf16>
    %c0_6 = arith.constant 0 : index
    %c0_7 = arith.constant 0 : index
    %c0_8 = arith.constant 0 : index
    %12 = vector.load %arg5[%c0_6, %c0_7, %c0_8] : memref<2x32x32xbf16, #tpu.memory_space<vmem>>, vector<1x32x32xbf16>
    %13 = vector.shape_cast %12 : vector<1x32x32xbf16> to vector<32x32xbf16>
    %cst_9 = arith.constant dense<0.000000e+00> : vector<8x32xf32>
    %14 = tpu.matmul %11, %13, %cst_9 {dimension_numbers = #tpu.dot_dimension_numbers<[1], [0], [0], [1], [0, 0, 1, 1], [], []>} : vector<8x32xbf16>, vector<32x32xbf16>, vector<8x32xf32> -> vector<8x32xf32>
    %c0_10 = arith.constant 0 : index
    %c0_11 = arith.constant 0 : index
    %c0_12 = arith.constant 0 : index
    %15 = vector.load %arg6[%c0_10, %c0_11, %c0_12] : memref<2x1x32xf32, #tpu.memory_space<vmem>>, vector<1x1x32xf32>
    %16 = vector.shape_cast %15 : vector<1x1x32xf32> to vector<1x32xf32>
    %17 = vector.broadcast %16 : vector<1x32xf32> to vector<8x32xf32>
    %18 = arith.addf %14, %17 : vector<8x32xf32>
    %cst_13 = arith.constant 0.000000e+00 : f32
    %19 = vector.broadcast %cst_13 : f32 to vector<8x32xf32>
    %20 = arith.maximumf %18, %19 : vector<8x32xf32>
    %21 = arith.truncf %20 : vector<8x32xf32> to vector<8x32xbf16>
    %c1 = arith.constant 1 : index
    %c0_14 = arith.constant 0 : index
    %c0_15 = arith.constant 0 : index
    %22 = vector.load %arg5[%c1, %c0_14, %c0_15] : memref<2x32x32xbf16, #tpu.memory_space<vmem>>, vector<1x32x32xbf16>
    %23 = vector.shape_cast %22 : vector<1x32x32xbf16> to vector<32x32xbf16>
    %cst_16 = arith.constant dense<0.000000e+00> : vector<8x32xf32>
    %24 = tpu.matmul %21, %23, %cst_16 {dimension_numbers = #tpu.dot_dimension_numbers<[1], [0], [0], [1], [0, 0, 1, 1], [], []>} : vector<8x32xbf16>, vector<32x32xbf16>, vector<8x32xf32> -> vector<8x32xf32>
    %c1_17 = arith.constant 1 : index
    %c0_18 = arith.constant 0 : index
    %c0_19 = arith.constant 0 : index
    %25 = vector.load %arg6[%c1_17, %c0_18, %c0_19] : memref<2x1x32xf32, #tpu.memory_space<vmem>>, vector<1x1x32xf32>
    %26 = vector.shape_cast %25 : vector<1x1x32xf32> to vector<1x32xf32>
    %27 = vector.broadcast %26 : vector<1x32xf32> to vector<8x32xf32>
    %28 = arith.addf %24, %27 : vector<8x32xf32>
    %cst_20 = arith.constant 0.000000e+00 : f32
    %29 = vector.broadcast %cst_20 : f32 to vector<8x32xf32>
    %30 = arith.maximumf %28, %29 : vector<8x32xf32>
    %31 = arith.truncf %30 : vector<8x32xf32> to vector<8x32xbf16>
    %c0_21 = arith.constant 0 : index
    %c0_22 = arith.constant 0 : index
    %32 = vector.load %arg7[%c0_21, %c0_22] : memref<32x16xbf16, #tpu.memory_space<vmem>>, vector<32x16xbf16>
    %cst_23 = arith.constant dense<0.000000e+00> : vector<8x16xf32>
    %33 = tpu.matmul %31, %32, %cst_23 {dimension_numbers = #tpu.dot_dimension_numbers<[1], [0], [0], [1], [0, 0, 1, 1], [], []>} : vector<8x32xbf16>, vector<32x16xbf16>, vector<8x16xf32> -> vector<8x16xf32>
    %c0_24 = arith.constant 0 : index
    %c0_25 = arith.constant 0 : index
    %34 = vector.load %arg8[%c0_24, %c0_25] : memref<1x16xf32, #tpu.memory_space<vmem>>, vector<1x16xf32>
    %35 = vector.broadcast %34 : vector<1x16xf32> to vector<8x16xf32>
    %36 = arith.addf %33, %35 : vector<8x16xf32>
    %37 = vector.extract_strided_slice %36 {offsets = [0, 0], sizes = [8, 8], strides = [1, 1]} : vector<8x16xf32> to vector<8x8xf32>
    %38 = vector.extract_strided_slice %36 {offsets = [0, 8], sizes = [8, 8], strides = [1, 1]} : vector<8x16xf32> to vector<8x8xf32>
    %39 = math.exp %38 : vector<8x8xf32>
    %40 = arith.mulf %39, %2 : vector<8x8xf32>
    %41 = arith.addf %37, %40 : vector<8x8xf32>
    %42 = math.tanh %41 : vector<8x8xf32>
    %c0_26 = arith.constant 0 : index
    %c0_27 = arith.constant 0 : index
    %43 = memref.load %arg1[%c0_26, %c0_27] : memref<1x1xf32, #tpu.memory_space<smem>>
    %44 = vector.broadcast %43 : f32 to vector<8x8xf32>
    %45 = arith.mulf %42, %44 : vector<8x8xf32>
    %cst_28 = arith.constant -2.000000e+00 : f32
    %46 = vector.broadcast %cst_28 : f32 to vector<8x8xf32>
    %47 = arith.mulf %46, %41 : vector<8x8xf32>
    %cst_29 = arith.constant 0.000000e+00 : f32
    %48 = vector.broadcast %cst_29 : f32 to vector<8x8xf32>
    %49 = arith.maximumf %47, %48 : vector<8x8xf32>
    %50 = math.absf %47 : vector<8x8xf32>
    %cst_30 = arith.constant 0.000000e+00 : f32
    %51 = vector.broadcast %cst_30 : f32 to vector<8x8xf32>
    %52 = arith.subf %51, %50 : vector<8x8xf32>
    %53 = math.exp %52 : vector<8x8xf32>
    %54 = math.log1p %53 : vector<8x8xf32>
    %55 = arith.addf %49, %54 : vector<8x8xf32>
    %cst_31 = arith.constant 0.693147182 : f32
    %56 = vector.broadcast %cst_31 : f32 to vector<8x8xf32>
    %57 = arith.subf %56, %41 : vector<8x8xf32>
    %58 = arith.subf %57, %55 : vector<8x8xf32>
    %cst_32 = arith.constant 2.000000e+00 : f32
    %59 = vector.broadcast %cst_32 : f32 to vector<8x8xf32>
    %60 = arith.mulf %59, %58 : vector<8x8xf32>
    %cst_33 = arith.constant -5.000000e-01 : f32
    %61 = vector.broadcast %cst_33 : f32 to vector<8x8xf32>
    %62 = arith.mulf %61, %2 : vector<8x8xf32>
    %63 = arith.mulf %62, %2 : vector<8x8xf32>
    %64 = arith.subf %63, %38 : vector<8x8xf32>
    %cst_34 = arith.constant 0.918938517 : f32
    %65 = vector.broadcast %cst_34 : f32 to vector<8x8xf32>
    %66 = arith.subf %64, %65 : vector<8x8xf32>
    %67 = arith.subf %66, %60 : vector<8x8xf32>
    %cst_35 = arith.constant dense<0.000000e+00> : vector<8xf32>
    %68 = vector.multi_reduction <add>, %67, %cst_35 [1] : vector<8x8xf32> to vector<8xf32>
    %69 = vector.shape_cast %68 : vector<8xf32> to vector<8x1xf32>
    %cst_36 = arith.constant 0.000000e+00 : f32
    %70 = vector.broadcast %cst_36 : f32 to vector<8x103xf32>
    %71 = tpu.concatenate %45, %37, %38, %69, %70 in 1 : vector<8x8xf32>, vector<8x8xf32>, vector<8x8xf32>, vector<8x1xf32>, vector<8x103xf32> -> vector<8x128xf32>
    %c0_37 = arith.constant 0 : index
    %c0_38 = arith.constant 0 : index
    %72 = vector.load %arg9[%c0_37, %c0_38] : memref<8x128xf32, #tpu.memory_space<vmem>>, vector<8x128xf32>
    tpu.vector_store %arg9[%c0_37, %c0_38], %71 {strides = array<i32>} : memref<8x128xf32, #tpu.memory_space<vmem>>, vector<8x128xf32>,
    return
  }
  func.func @transform_0(%arg0: i32) -> (i32, i32) {
    %c0_i32 = arith.constant 0 : i32
    %c0_i32_0 = arith.constant 0 : i32
    %c0_i32_1 = arith.constant 0 : i32
    return %c0_i32, %c0_i32_0 : i32, i32
  }
  func.func @transform_1(%arg0: i32) -> (i32, i32) {
    %c0_i32 = arith.constant 0 : i32
    %c0_i32_0 = arith.constant 0 : i32
    return %arg0, %c0_i32 : i32, i32
  }
  func.func @transform_2(%arg0: i32) -> (i32, i32) {
    %c0_i32 = arith.constant 0 : i32
    %c0_i32_0 = arith.constant 0 : i32
    %c0_i32_1 = arith.constant 0 : i32
    return %c0_i32, %c0_i32_0 : i32, i32
  }
  func.func @transform_3(%arg0: i32) -> (i32, i32) {
    %c0_i32 = arith.constant 0 : i32
    %c0_i32_0 = arith.constant 0 : i32
    %c0_i32_1 = arith.constant 0 : i32
    return %c0_i32, %c0_i32_0 : i32, i32
  }
  func.func @transform_4(%arg0: i32) -> (i32, i32, i32) {
    %c0_i32 = arith.constant 0 : i32
    %c0_i32_0 = arith.constant 0 : i32
    %c0_i32_1 = arith.constant 0 : i32
    %c0_i32_2 = arith.constant 0 : i32
    return %c0_i32, %c0_i32_0, %c0_i32_1 : i32, i32, i32
  }
  func.func @transform_5(%arg0: i32) -> (i32, i32, i32) {
    %c0_i32 = arith.constant 0 : i32
    %c0_i32_0 = arith.constant 0 : i32
    %c0_i32_1 = arith.constant 0 : i32
    %c0_i32_2 = arith.constant 0 : i32
    return %c0_i32, %c0_i32_0, %c0_i32_1 : i32, i32, i32
  }
  func.func @transform_6(%arg0: i32) -> (i32, i32) {
    %c0_i32 = arith.constant 0 : i32
    %c0_i32_0 = arith.constant 0 : i32
    %c0_i32_1 = arith.constant 0 : i32
    return %c0_i32, %c0_i32_0 : i32, i32
  }
  func.func @transform_7(%arg0: i32) -> (i32, i32) {
    %c0_i32 = arith.constant 0 : i32
    %c0_i32_0 = arith.constant 0 : i32
    %c0_i32_1 = arith.constant 0 : i32
    return %c0_i32, %c0_i32_0 : i32, i32
  }
  func.func @transform_8(%arg0: i32) -> (i32, i32) {
    %c0_i32 = arith.constant 0 : i32
    %c0_i32_0 = arith.constant 0 : i32
    return %arg0, %c0_i32 : i32, i32
  }
}

</mosaic_0001>

<bundles_post_ra>
// kernel: tpu_custom_call.1
= control target key start
LH: loop header
LB: loop body
LE: loop exit
PB: predicated region body
PF: predicated region fallthrough
CT: control target
= control target key end

     0   :  { %14 = vsyncpa [#allocation4], 0  ;;  %s750_s0 = inlined_call_operand.<no memory space> [shape: f32[1,1], index: 0, kind: input, shape index: {}]   ;;  %s751_s1 = inlined_call_operand.hbm [shape: f32[8,24], index: 1, kind: input, shape index: {}]   ;;  %s752_s2 = inlined_call_operand.hbm [shape: bf16[16,32], index: 2, kind: input, shape index: {}]   ;;  %s753_s3 = inlined_call_operand.hbm [shape: f32[1,32], index: 3, kind: input, shape index: {}]   ;;  %s754_s4 = inlined_call_operand.vmem [shape: bf16[2,32,32], index: 4, kind: input, shape index: {}]   ;;  %s755_s5 = inlined_call_operand.vmem [shape: f32[2,1,32], index: 5, kind: input, shape index: {}]   ;;  %s756_s6 = inlined_call_operand.vmem [shape: bf16[32,16], index: 6, kind: input, shape index: {}]   ;;  %s757_s7 = inlined_call_operand.vmem [shape: f32[1,16], index: 7, kind: input, shape index: {}]   ;;  %s758_s8 = inlined_call_operand.hbm [shape: f32[8,128], index: 8, kind: output, shape index: {}]  }
   0x1   :  { %15 = vsyncpa [#allocation7], 0 }
   0x2   :  { %16 = vsyncpa [#allocation5], 0  ;;  %s599_s27 = smov [#allocation6]   ;;  %s505_s9 = scalar_lea.hbm %s752_s2, 128 }
   0x3   :  { %s34_s28 = sshll.u32 %s599_s27, 4  ;;  %p506_p0 = scmp.ne.s32.totalorder %s752_s2, %s505_s9  ;;  %s35_s28 = int_to_ptr.vmem [resolvable:$true] %s34_s28 }
   0x4   :  { %p509_p1 = scmp.lt.u32.totalorder %s505_s9, %s752_s2 }
   0x6   :  { %p511_p2 = pnand %p509_p1, %p506_p0 }
   0x8   :  { %514 = shalt.err (!%p511_p2)
}
   0x9   :  { %s515_s14 = scalar_lea.vmem %s35_s28, 128  ;;  %p520_p4 = scmp.lt.s32.totalorder %s35_s28, %s35_s28 }
   0xa   :  { %p516_p3 = scmp.ne.s32.totalorder %s35_s28, %s515_s14  ;;  %p521_p5 = scmp.lt.s32.totalorder %s515_s14, %s515_s14 }
   0xc   :  { %p522_p6 = por %p521_p5, %p520_p4 }
   0xe   :  { %p523_p7 = pnand %p522_p6, %p516_p3 }
  0x10   :  { %526 = shalt.err (!%p523_p7)
}
  0x11   :  { %s600_s15 = smov 64   ;;  %s601_s16 = smov 4  }
  0x12   :  { %40 = dma.hbm_to_vmem [thread:$0]  %s752_s2, 128, %s35_s28, [#allocation7], %s600_s15, %s600_s15, %s601_s16  }
  0x13   :  { %s602_s19 = smov [#allocation3]   ;;  %s603_s21 = smov [#allocation8]  }
  0x14   :  { %s25_s20 = sshll.u32 %s602_s19, 4  ;;  %s47_s22 = sshll.u32 %s603_s21, 4  ;;  %s26_s20 = int_to_ptr.vmem [resolvable:$true] %s25_s20  ;;  %s48_s22 = int_to_ptr.vmem [resolvable:$true] %s47_s22 }
  0x15   :  { %s527_s25 = scalar_lea.hbm %s751_s1, 128 }
  0x16   :  { %p528_p8 = scmp.ne.s32.totalorder %s751_s1, %s527_s25  ;;  %p531_p9 = scmp.lt.u32.totalorder %s527_s25, %s751_s1 }
  0x18   :  { %p533_p10 = pnand %p531_p9, %p528_p8 }
  0x1a   :  { %536 = shalt.err (!%p533_p10)
}
  0x1b   :  { %s537_s2 = scalar_lea.vmem %s26_s20, 128  ;;  %p542_p12 = scmp.lt.s32.totalorder %s26_s20, %s26_s20 }
  0x1c   :  { %p538_p11 = scmp.ne.s32.totalorder %s26_s20, %s537_s2  ;;  %p543_p13 = scmp.lt.s32.totalorder %s537_s2, %s537_s2 }
  0x1e   :  { %p544_p0 = por %p543_p13, %p542_p12 }
  0x20   :  { %p545_p1 = pnand %p544_p0, %p538_p11 }
  0x22   :  { %548 = shalt.err (!%p545_p1)
}
  0x23   :  { %28 = dma.hbm_to_vmem [thread:$0]  %s751_s1, 128, %s26_s20, [#allocation4]  }
  0x24   :  { %s549_s12 = scalar_lea.hbm %s753_s3, 16 }
  0x25   :  { %p550_p2 = scmp.ne.s32.totalorder %s753_s3, %s549_s12  ;;  %p553_p3 = scmp.lt.u32.totalorder %s549_s12, %s753_s3 }
  0x27   :  { %p555_p4 = pnand %p553_p3, %p550_p2 }
  0x29   :  { %558 = shalt.err (!%p555_p4)
}
  0x2a   :  { %s559_s17 = scalar_lea.vmem %s48_s22, 16  ;;  %s563_s18 = scalar_lea.vmem %s48_s22, 32 }
  0x2b   :  { %p560_p5 = scmp.ne.s32.totalorder %s48_s22, %s559_s17  ;;  %p564_p6 = scmp.lt.s32.totalorder %s48_s22, %s48_s22 }
  0x2c   :  { %p565_p7 = scmp.lt.s32.totalorder %s563_s18, %s559_s17 }
  0x2e   :  { %p566_p8 = por %p565_p7, %p564_p6 }
  0x30   :  { %p567_p9 = pnand %p566_p8, %p560_p5 }
  0x32   :  { %570 = shalt.err (!%p567_p9)
}
  0x33   :  { %50 = dma.hbm_to_vmem [thread:$0]  %s753_s3, 16, %s48_s22, [#allocation7]  }
  0x34   :  { %593 = dma.done.wait [#allocation4], 128  }
  0x35   :  { %594 = vsyncadd [#allocation4], 4294967168 }
  0x36   :  { %595 = dma.done.wait [#allocation7], 144  }
  0x37   :  { %596 = vsyncadd [#allocation7], 4294967152  ;;  %v604_v0 = vmov 0.0   ;;  %vm605_vm0 = vmmov 0   ;;  %v490_v1 = vld [vmem:[#allocation6] sm:$0xff]   ;;  %v694_v2 = vld [vmem:[#allocation3] sm:$0xff] }
  0x38   :  { %448 = vmatprep.subr.bf16.mxu0 %v604_v0  ;;  %450 = vmatprep.mubr.msk.bf16.mxu0 %vm605_vm0, %v604_v0  ;;  %vm86_vm1 = vcmask 130048   ;;  %v70_v3 = vpack.c.bf16 %v694_v2, %v694_v2  ;;  %v491_v4 = vld [vmem:[%s754_s4] sm:$0xff]   ;;  %v492_v5 = vld [vmem:[%s754_s4 + $0x8] sm:$0xff]   ;;  %v493_v6 = vld [vmem:[%s754_s4 + $0x10] sm:$0xff]   ;;  %vm155_vm2 = vcmask 261120   ;;  %s606_s9 = smov 120  }
  0x39   :  { %454 = vmatprep.subr.bf16.mxu1 %v604_v0  ;;  %458 = vmatprep.mubr.msk.bf16.mxu1 %vm605_vm0, %v604_v0  ;;  %v416_v7 = vld [vmem:[#allocation8] ss:$0 sm:$0xff]  ;;  %v494_v15 = vld [vmem:[%s754_s4 + $0x18] sm:$0xff]   ;;  %v495_v16 = vld [vmem:[%s756_s6] sm:$0xff]   ;;  %vm389_vm4 = vcmask 64512   ;;  %vm395_vm5 = vcmask 195584  }
  0x3a   :  { %449 = vmatpush3.bf16.msra.mxu0 %v490_v1  ;;  %455 = vmatpush3.bf16.msra.mxu1 %v491_v4  ;;  %v419_v17 = vld [vmem:[%s755_s5] ss:$0 sm:$0xff]  ;;  %v496_v25 = vld [vmem:[%s756_s6 + $0x8] sm:$0xff]   ;;  %v428_v26 = vld [vmem:[%s755_s5 + $0x1] ss:$0 sm:$0xff]  ;;  %s607_s6 = smov 8  }
  0x3b   :  { %462 = vmatprep.subr.bf16.mxu0 %v604_v0  ;;  %456 = vmatprep.subr.bf16.mxu1 %v604_v0  ;;  %v432_v34 = vld [vmem:[%s757_s7] ss:$0 sm:$0xff]  ;;  %s608_s5 = smov 16   ;;  %s609_s7 = smov 112   ;;  %vm397_vm6 = vcmask 203776  }
  0x3c   :  { %340 = vrot.lane.b32.xlu0 %v694_v2, %s606_s9  ;;  %s610_s16 = smov [#allocation9]  }
  0x3d   :  { %451 = vmatmul.mubr.msk.bf16.vlgmr.msra.gmra.mrb[0].mxu0 %vm86_vm1, %v70_v3  ;;  %s406_s17 = sshll.u32 %s610_s16, 4  ;;  %s407_s17 = int_to_ptr.vmem [resolvable:$true] %s406_s17 }
  0x3e   :  { %466 = vmatprep.mubr.msk.bf16.mxu0 %vm605_vm0, %v604_v0  ;;  %457 = vmatpush3.bf16.msra.mxu1 %v492_v5  ;;  %s571_s18 = scalar_lea.vmem %s407_s17, 128  ;;  %p576_p11 = scmp.lt.s32.totalorder %s407_s17, %s407_s17 }
  0x3f   :  { %470 = vmatprep.subr.bf16.mxu1 %v604_v0  ;;  %463 = vmatpush3.bf16.msra.mxu0 %v493_v6  ;;  %p572_p10 = scmp.ne.s32.totalorder %s407_s17, %s571_s18  ;;  %p577_p12 = scmp.lt.s32.totalorder %s571_s18, %s571_s18 }
  0x40   :  { %464 = vmatprep.subr.bf16.mxu0 %v604_v0 }
  0x41   :  { %p578_p13 = por %p577_p12, %p576_p11 }
  0x43   :  { %465 = vmatpush3.bf16.msra.mxu0 %v494_v15  ;;  %p579_p0 = pnand %p578_p13, %p572_p10 }
  0xae   :  { %v341_v41 = vpop.permute.xlu0 %340 }
 0x110   :  { %v124_v8 = vpop.f32.mrb[0].mxu0 }
 0x111   :  { %v125_v9 = vadd.f32 %v416_v7, %v124_v8  ;;  %v452_v10 = vpop.f32.mrb[1].mxu0 }
 0x112   :  { %v127_v11 = vpop.f32.mrb[2].mxu0 }
 0x113   :  { %v130_v12 = vmax.f32 %v125_v9, 0.0  ;;  %v453_v13 = vpop.f32.mrb[3].mxu0  ;;  %v351_v11 = vstv %s750_s0 }
 0x115   :  { %v131_v14 = vpack.c.bf16 %v130_v12, %v130_v12 }
 0x117   :  { %459 = vmatmul.mubr.msk.bf16.vlgmr.msra.gmra.mrb[0].mxu1 %vm155_vm2, %v131_v14 }
 0x118   :  { %474 = vmatprep.mubr.msk.bf16.mxu1 %vm605_vm0, %v604_v0  ;;  %471 = vmatpush3.bf16.msra.mxu1 %v495_v16 }
 0x119   :  { %472 = vmatprep.subr.bf16.mxu1 %v604_v0  ;;  %v372_v0 = vmul.f32 -0.5, %v694_v2 }
 0x11b   :  { %v373_v1 = vmul.f32 %v372_v0, %v694_v2 }
 0x11c   :  { %473 = vmatpush3.bf16.msra.mxu1 %v496_v25 }
 0x1ea   :  { %v193_v18 = vpop.f32.mrb[0].mxu1 }
 0x1eb   :  { %v194_v19 = vadd.f32 %v419_v17, %v193_v18  ;;  %v460_v20 = vpop.f32.mrb[1].mxu1 }
 0x1ec   :  { %v196_v21 = vpop.f32.mrb[2].mxu1 }
 0x1ed   :  { %v199_v22 = vmax.f32 %v194_v19, 0.0  ;;  %v461_v23 = vpop.f32.mrb[3].mxu1 }
 0x1ef   :  { %v200_v24 = vpack.c.bf16 %v199_v22, %v199_v22 }
 0x1f1   :  { %467 = vmatmul.mubr.msk.bf16.vlgmr.msra.gmra.mrb[4].mxu0 %vm155_vm2, %v200_v24 }
 0x2c4   :  { %v263_v27 = vpop.f32.mrb[4].mxu0 }
 0x2c5   :  { %v264_v28 = vadd.f32 %v428_v26, %v263_v27  ;;  %v468_v29 = vpop.f32.mrb[5].mxu0 }
 0x2c6   :  { %v266_v30 = vpop.f32.mrb[6].mxu0 }
 0x2c7   :  { %v269_v31 = vmax.f32 %v264_v28, 0.0  ;;  %v469_v32 = vpop.f32.mrb[7].mxu0 }
 0x2c9   :  { %v270_v33 = vpack.c.bf16 %v269_v31, %v269_v31 }
 0x2cb   :  { %475 = vmatmul.mubr.msk.bf16.vlgmr.msra.gmra.mrb[4].mxu1 %vm155_vm2, %v270_v33 }
 0x39e   :  { %v331_v35 = vpop.f32.mrb[4].mxu1 }
 0x39f   :  { %v332_v36 = vadd.f32 %v432_v34, %v331_v35  ;;  %v476_v37 = vpop.f32.mrb[5].mxu1 }
 0x3a0   :  { %v334_v38 = vpop.f32.mrb[6].mxu1 }
 0x3a1   :  { %v337_v39 = vmul.f32 1.442695, %v332_v36  ;;  %375 = vrot.lane.b32.xlu1 %v332_v36, %s607_s6  ;;  %v477_v40 = vpop.f32.mrb[7].mxu1 }
 0x3a3   :  { %497 = vpow2.f32 %v337_v39 }
 0x3ad   :  { %v498_v42 = vpop.eup %497 }
 0x3ae   :  { %v343_v43 = vmul.f32 %v498_v42, %v341_v41 }
 0x3b0   :  { %345 = vrot.lane.b32.xlu0 %v343_v43, %s606_s9 }
 0x413   :  { %v376_v3 = vpop.permute.xlu1 %375 }
 0x414   :  { %v378_v4 = vsub.f32 %v373_v1, %v376_v3 }
 0x416   :  { %v436_v5 = vadd.f32 -0.9189385, %v378_v4 }
 0x422   :  { %v346_v44 = vpop.permute.xlu0 %345 }
 0x423   :  { %v348_v45 = vadd.f32 %v346_v44, %v332_v36 }
 0x425   :  { %v353_v46 = vmul.f32 -2.0, %v348_v45  ;;  %v369_v60 = vsub.f32 0.6931472, %v348_v45 }
 0x427   :  { %v355_v47 = vand.u32 2147483647, %v353_v46  ;;  %v354_v58 = vmax.f32 %v353_v46, 0.0 }
 0x429   :  { %v356_v48 = vsub.f32 0.0, %v355_v47 }
 0x42b   :  { %v357_v49 = vmul.f32 1.442695, %v356_v48 }
 0x42d   :  { %499 = vpow2.f32 %v357_v49 }
 0x437   :  { %v500_v50 = vpop.eup %499 }
 0x438   :  { %v359_v51 = vadd.f32 1.0, %v500_v50  ;;  %v362_v52 = vmul.f32 -0.5, %v500_v50  ;;  %v365_v54 = vand.u32 2147483647, %v500_v50 }
 0x43a   :  { %501 = vlog2.f32 %v359_v51  ;;  %v363_v53 = vadd.f32 1.0, %v362_v52  ;;  %vm366_vm3 = vcmp.lt.f32.partialorder %v365_v54, 0.0004427343 }
 0x43b   :  { %503 = vtanh.f32 %v348_v45 }
 0x43c   :  { %v364_v57 = vmul.f32 %v500_v50, %v363_v53 }
 0x444   :  { %v502_v55 = vpop.eup %501 }
 0x445   :  { %v361_v56 = vmul.f32 0.6931472, %v502_v55  ;;  %v504_v10 = vpop.eup %503 }
 0x446   :  { %v352_v12 = vmul.f32 %v504_v10, %v351_v11 }
 0x447   :  { %v367_v59 = vsel %vm366_vm3, %v364_v57, %v361_v56 }
 0x448   :  { %v368_v61 = vadd.f32 %v367_v59, %v354_v58  ;;  %v393_v13 = vsel %vm389_vm4, %v352_v12, %v376_v3 }
 0x449   :  { %v394_v14 = vsel %vm86_vm1, %v393_v13, %v376_v3 }
 0x44a   :  { %v370_v62 = vsub.f32 %v369_v60, %v368_v61 }
 0x44c   :  { %v371_v63 = vmul.f32 2.0, %v370_v62 }
 0x44e   :  { %381 = vrot.lane.b32.xlu1 %v371_v63, %s608_s5 }
 0x4c0   :  { %v382_v6 = vpop.permute.xlu1 %381 }
 0x4c1   :  { %v384_v7 = vsub.f32 %v436_v5, %v382_v6 }
 0x4c3   :  { %386 = vrot.lane.b32.xlu0 %v384_v7, %s609_s7 }
 0x535   :  { %v387_v8 = vpop.permute.xlu0 %386 }
 0x536   :  { %v390_v9 = vsel %vm389_vm4, %v387_v8, 0.0 }
 0x537   :  { %391 = vadd.xlane.f32.xlu1 %v390_v9 }
 0x5c4   :  { %v392_v2 = vpop.xlane.xlu1 %391 }
 0x5c5   :  { %v396_v15 = vsel %vm395_vm5, %v394_v14, %v392_v2 }
 0x5c6   :  { %v398_v16 = vsel %vm397_vm6, %v396_v15, 0.0 }
 0x5c7   :  { %399 = vst [vmem:[#allocation9] sm:$0xff] %v398_v16 }
 0x5c8   :  { %582 = shalt.err (!%p579_p0)
}
 0x5c9   :  { %s583_s19 = scalar_lea.hbm %s758_s8, 128 }
 0x5ca   :  { %p584_p1 = scmp.ne.s32.totalorder %s758_s8, %s583_s19  ;;  %p587_p2 = scmp.lt.u32.totalorder %s583_s19, %s758_s8 }
 0x5cc   :  { %p589_p3 = pnand %p587_p2, %p584_p1 }
 0x5ce   :  { %592 = shalt.err (!%p589_p3)
}
 0x5cf   :  { %409 = dma.vmem_to_hbm [thread:$0]  %s407_s17, 128, %s758_s8, [#allocation5]  }
 0x5d0   :  { %597 = dma.done.wait [#allocation5], 128  }
 0x5d1   :  { %598 = vsyncadd [#allocation5], 4294967168 }
 0x5d2   :  { %413 = vsyncpa [#allocation4], 1 }
 0x5d3   :  { %414 = vsyncpa [#allocation7], 1 }
 0x5d4   :  { %415 = vsyncpa [#allocation5], 1 }

</bundles_post_ra>
